<compile_context>
chip_gen: v5e
topology: v5e:2x2
jax: 0.10.0
libtpu: 0.0.40
codegen_flags: <defaults>
</compile_context>

<pallas_src>
import jax
import jax.numpy as jnp
from jax.experimental import pallas as pl
from jax.experimental.pallas import tpu as pltpu

LANE = 128
_WIDTH_CANDIDATES = (2048, 1024, 512, 256, 128)
# 2 MiB per tile: (in + out) x double-buffer = 8 MiB, safe on every generation's
# default scoped VMEM; beyond ~1-4 MiB the bandwidth curve is flat.
_TARGET_TILE_BYTES = 2 * 1024 * 1024


def _heaviside_kernel(x_ref, o_ref):
    # One compare + one cast; no broadcast temporaries, minimal vreg pressure.
    o_ref[...] = (x_ref[...] > 0).astype(o_ref.dtype)


def heaviside(x: jax.Array) -> jax.Array:
    """Elementwise Heaviside with zero-valued `values` tensor (same shape/dtype)."""
    orig_shape = x.shape
    dtype = x.dtype
    itemsize = jnp.dtype(dtype).itemsize

    flat = x.reshape(-1)
    n = flat.shape[0]

    # Minimal padding: only pad up to a multiple of 128 lanes when strictly needed.
    n_pad = (-n) % LANE
    if n_pad:
        flat = jnp.concatenate([flat, jnp.zeros((n_pad,), dtype=dtype)])
    padded_n = n + n_pad

    # Wide, lane-dense slab: pick the widest last dim that divides the data.
    width = next(w for w in _WIDTH_CANDIDATES if padded_n % w == 0)
    rows = padded_n // width

    # Sublane multiple: 8 for 32-bit, 16 for 16-bit, 32 for 8-bit dtypes.
    sub_mult = 8 * max(1, 4 // itemsize)

    # Row tile sized to ~_TARGET_TILE_BYTES, rounded to the sublane multiple.
    row_tile = max(
        sub_mult,
        (_TARGET_TILE_BYTES // (width * itemsize)) // sub_mult * sub_mult,
    )

    if rows <= row_tile:
        # Single block covering the whole array (always a legal block shape).
        block_rows = rows
        grid = (1,)
    else:
        block_rows = row_tile
        # Partial last block (if rows % row_tile != 0) is masked by Pallas.
        grid = (pl.cdiv(rows, row_tile),)

    x2d = flat.reshape(rows, width)

    out2d = pl.pallas_call(
        _heaviside_kernel,
        out_shape=jax.ShapeDtypeStruct((rows, width), dtype),
        grid=grid,
        in_specs=[pl.BlockSpec((block_rows, width), lambda i: (i, 0))],
        out_specs=pl.BlockSpec((block_rows, width), lambda i: (i, 0)),
        compiler_params=pltpu.CompilerParams(
            dimension_semantics=("parallel",),
        ),
    )(x2d)

    out_flat = out2d.reshape(-1)
    if n_pad:
        out_flat = out_flat[:n]
    return out_flat.reshape(orig_shape)


if __name__ == "__main__":
    key = jax.random.PRNGKey(0)

    # Small NCHW input consistent with typical use of the module.
    x = jax.random.normal(key, (2, 4, 16, 16), dtype=jnp.float32)
    # Force a few exact zeros to exercise the x == 0 branch (values == 0 -> output 0).
    x = x.at[0, 0, 0, :4].set(0.0)

    out = heaviside(x)
    jax.block_until_ready(out)

    ref = (x > 0).astype(x.dtype)
    assert out.shape == x.shape and out.dtype == x.dtype
    assert bool(jnp.array_equal(out, ref))

    # Also exercise the non-128-aligned (padding) path with a small odd shape.
    x2 = jax.random.normal(jax.random.PRNGKey(1), (3, 5, 7, 11), dtype=jnp.float32)
    out2 = heaviside(x2)
    jax.block_until_ready(out2)
    ref2 = (x2 > 0).astype(x2.dtype)
    assert out2.shape == x2.shape and out2.dtype == x2.dtype
    assert bool(jnp.array_equal(out2, ref2))

    print("KERNEL_OK")
</pallas_src>

<mosaic_0001>
module attributes {stable_mosaic.version = 11 : i64} {
  func.func @_heaviside_kernel(%arg0: i32, %arg1: memref<1x2048xf32, #tpu.memory_space<vmem>>, %arg2: memref<1x2048xf32, #tpu.memory_space<vmem>>) attributes {dimension_semantics = [#tpu.dimension_semantics<parallel>], iteration_bounds = array<i64: 1>, scalar_prefetch = 0 : i64, scratch_operands = 0 : i64, tpu.core_type = #tpu.core_type<tc>, window_params = [{transform_indices = @transform_0, window_bounds = array<i64: 1, 2048>}, {transform_indices = @transform_1, window_bounds = array<i64: 1, 2048>}]} {
    %c0 = arith.constant 0 : index
    %c0_0 = arith.constant 0 : index
    %0 = vector.load %arg1[%c0, %c0_0] : memref<1x2048xf32, #tpu.memory_space<vmem>>, vector<1x2048xf32>
    %cst = arith.constant 0.000000e+00 : f32
    %1 = vector.broadcast %cst : f32 to vector<1x2048xf32>
    %2 = arith.cmpf ogt, %0, %1 : vector<1x2048xf32>
    %3 = arith.extui %2 : vector<1x2048xi1> to vector<1x2048xi32>
    %4 = arith.sitofp %3 : vector<1x2048xi32> to vector<1x2048xf32>
    %c0_1 = arith.constant 0 : index
    %c0_2 = arith.constant 0 : index
    %5 = vector.load %arg2[%c0_1, %c0_2] : memref<1x2048xf32, #tpu.memory_space<vmem>>, vector<1x2048xf32>
    tpu.vector_store %arg2[%c0_1, %c0_2], %4 {strides = array<i32>} : memref<1x2048xf32, #tpu.memory_space<vmem>>, vector<1x2048xf32>,
    return
  }
  func.func @transform_0(%arg0: i32) -> (i32, i32) {
    %c0_i32 = arith.constant 0 : i32
    %c0_i32_0 = arith.constant 0 : i32
    return %arg0, %c0_i32 : i32, i32
  }
  func.func @transform_1(%arg0: i32) -> (i32, i32) {
    %c0_i32 = arith.constant 0 : i32
    %c0_i32_0 = arith.constant 0 : i32
    return %arg0, %c0_i32 : i32, i32
  }
}

</mosaic_0001>

<bundles_post_ra>
// kernel: tpu_custom_call.1
= control target key start
LH: loop header
LB: loop body
LE: loop exit
PB: predicated region body
PF: predicated region fallthrough
CT: control target
= control target key end

     0   :  { %6 = vsyncpa [#allocation3], 0  ;;  %s126_s0 = inlined_call_operand.hbm [shape: f32[1,2048], index: 0, kind: input, shape index: {}]   ;;  %s127_s1 = inlined_call_operand.hbm [shape: f32[1,2048], index: 1, kind: output, shape index: {}]  }
   0x1   :  { %7 = vsyncpa [#allocation4], 0  ;;  %s13_s8 = sshll.u32 %s126_s0, 4  ;;  %s107_s9 = smov [#allocation2]   ;;  %s14_s8 = int_to_ptr.hbm [resolvable:$true] %s13_s8 }
   0x2   :  { %s15_s10 = sshll.u32 %s107_s9, 4  ;;  %s16_s10 = int_to_ptr.vmem [resolvable:$true] %s15_s10 }
   0x3   :  { %18 = dma.hbm_to_vmem [thread:$0]  %s14_s8, 256, %s16_s10, [#allocation3]  }
   0x4   :  { %103 = dma.done.wait [#allocation3], 256  }
   0x5   :  { %104 = vsyncadd [#allocation3], 4294967040  ;;  %s108_s11 = smov [#allocation5]   ;;  %s40_s15 = sshll.u32 %s127_s1, 4  ;;  %v23_v0 = vld [vmem:[#allocation2] sm:$0xff]  ;;  %v24_v1 = vld [vmem:[#allocation2 + $0x8] sm:$0xff]  ;;  %s41_s15 = int_to_ptr.hbm [resolvable:$true] %s40_s15 }
   0x6   :  { %s38_s12 = sshll.u32 %s108_s11, 4  ;;  %vm25_vm0 = vcmp.gt.f32.partialorder %v23_v0, 0.0  ;;  %vm26_vm1 = vcmp.gt.f32.partialorder %v24_v1, 0.0  ;;  %v109_v2 = vmov 0.0   ;;  %s39_s12 = int_to_ptr.vmem [resolvable:$true] %s38_s12 }
   0x7   :  { %v50_v3 = vsel %vm25_vm0, 1.0, %v109_v2  ;;  %v51_v4 = vsel %vm26_vm1, 1.0, %v109_v2 }
   0x8   :  { %31 = vst [vmem:[#allocation5] sm:$0xff] %v50_v3 }
   0x9   :  { %32 = vst [vmem:[#allocation5 + $0x8] sm:$0xff] %v51_v4 }
   0xa   :  { %43 = dma.vmem_to_hbm [thread:$0]  %s39_s12, 256, %s41_s15, [#allocation4]  }
   0xb   :  { %105 = dma.done.wait [#allocation4], 256  }
   0xc   :  { %106 = vsyncadd [#allocation4], 4294967040 }
   0xd   :  { %48 = vsyncpa [#allocation3], 1 }
   0xe   :  { %49 = vsyncpa [#allocation4], 1 }

</bundles_post_ra>
